<compile_context>
chip_gen: v7x
topology: tpu7x:2x2x1
jax: 0.10.0
libtpu: 0.0.40
codegen_flags: <defaults>
</compile_context>

<pallas_src>
import functools

import jax
import jax.numpy as jnp
from jax.experimental import pallas as pl
from jax.experimental.pallas import tpu as pltpu


def _round_up(x, m):
    return ((x + m - 1) // m) * m


@functools.lru_cache(maxsize=1)
def _is_v7x():
    """True iff the default backend is a v7x-class TPU (2 TensorCores/chip)."""
    try:
        kind = jax.devices()[0].device_kind.lower()
    except Exception:
        return False
    return "v7" in kind


def _mlp_kernel(z_ref, w1_ref, b1_ref, w2_ref, b2_ref, w3_ref, b3_ref, o_ref):
    # z_ref is the HBM dtype (f32); weights / hidden biases are bf16.
    # MXU matmuls accumulate in f32; hidden-layer bias+ReLU run in bf16 so the
    # VPU epilogue is half-width on bf16-native VPUs (v6e/v7x).
    x = z_ref[...].astype(jnp.bfloat16)

    h1 = jnp.dot(x, w1_ref[...], preferred_element_type=jnp.float32)
    h1 = jnp.maximum(h1.astype(jnp.bfloat16) + b1_ref[...], 0)

    h2 = jnp.dot(h1, w2_ref[...], preferred_element_type=jnp.float32)
    h2 = jnp.maximum(h2.astype(jnp.bfloat16) + b2_ref[...], 0)

    out = jnp.dot(h2, w3_ref[...], preferred_element_type=jnp.float32) + b3_ref[...]
    o_ref[...] = out.astype(o_ref.dtype)


@functools.partial(jax.jit, static_argnames=("block_b",))
def noise_predictor_forward(z_t, t, params, *, block_b=2048):
    """Fused MLP forward. `params` should come from prepare_noise_predictor_params.

    t is accepted for API parity with the PyTorch module but is unused there.
    """
    del t
    w1, b1, w2, b2, w3, b3 = params
    B, D = z_t.shape
    H = w1.shape[1]

    # --- Batch tiling.
    bm = min(block_b, B)
    # Multiple of 256 keeps MXU M-passes full; multiple of 16 keeps bf16 rows
    # fully packed. (When bm < 16, bm == B, so the block equals the array dim.)
    if bm >= 256:
        bm = (bm // 256) * 256
    elif bm >= 16:
        bm = (bm // 16) * 16
    # v7x has 2 TensorCores per chip: force an even number of >=2 grid steps so
    # megacore sharding is balanced. Single-TC v5e/v6e keep one big step.
    if _is_v7x() and B >= 512:
        steps = pl.cdiv(B, bm)
        if steps < 2 or steps % 2:
            steps = max(2, steps + (steps % 2))
            bm = _round_up(pl.cdiv(B, steps), 256)
    grid = (pl.cdiv(B, bm),)

    # Weights / biases: full block, resident (constant index_map) across grid.
    rep2 = lambda i: (0, 0)

    flops = 2 * B * (D * H + H * H + H * D)
    bytes_accessed = (
        B * D * z_t.dtype.itemsize        # z_t
        + B * D * 4                       # output (f32)
        + (D * H + H * H + H * D) * 2     # one copy of the bf16 weights
        + 2 * H * 2 + D * 4               # biases (bf16, bf16, f32)
    )
    cost = pl.CostEstimate(flops=flops, transcendentals=0,
                           bytes_accessed=bytes_accessed)

    out = pl.pallas_call(
        _mlp_kernel,
        out_shape=jax.ShapeDtypeStruct((B, D), jnp.float32),
        grid_spec=pltpu.PrefetchScalarGridSpec(
            num_scalar_prefetch=0,
            grid=grid,
            in_specs=[
                pl.BlockSpec((bm, D), lambda i: (i, 0)),  # z_t batch tile
                pl.BlockSpec((D, H), rep2),               # W1 (bf16)
                pl.BlockSpec((1, H), rep2),               # b1 (bf16)
                pl.BlockSpec((H, H), rep2),               # W2 (bf16)
                pl.BlockSpec((1, H), rep2),               # b2 (bf16)
                pl.BlockSpec((H, D), rep2),               # W3 (bf16)
                pl.BlockSpec((1, D), rep2),               # b3 (f32)
            ],
            out_specs=pl.BlockSpec((bm, D), lambda i: (i, 0)),
        ),
        compiler_params=pltpu.CompilerParams(
            dimension_semantics=("parallel",),
            vmem_limit_bytes=48 * 1024 * 1024,
        ),
        cost_estimate=cost,
    )(z_t, w1, b1, w2, b2, w3, b3)

    return out


def init_noise_predictor_params(key, latent_dim, hidden=512, dtype=jnp.float32):
    """Deterministic init mimicking nn.Linear's U(-1/sqrt(fan_in), 1/sqrt(fan_in))."""
    keys = jax.random.split(key, 6)

    def linear(kw, kb, fan_in, fan_out):
        bound = 1.0 / jnp.sqrt(jnp.asarray(fan_in, jnp.float32))
        w = jax.random.uniform(kw, (fan_in, fan_out), dtype, -bound, bound)
        b = jax.random.uniform(kb, (1, fan_out), dtype, -bound, bound)
        return w, b

    w1, b1 = linear(keys[0], keys[1], latent_dim, hidden)
    w2, b2 = linear(keys[2], keys[3], hidden, hidden)
    w3, b3 = linear(keys[4], keys[5], hidden, latent_dim)
    return (w1, b1, w2, b2, w3, b3)


def prepare_noise_predictor_params(params):
    """One-time cast to kernel dtypes (do at init, NOT per forward call)."""
    w1, b1, w2, b2, w3, b3 = params
    return (
        w1.astype(jnp.bfloat16),
        b1.astype(jnp.bfloat16),   # hidden-layer bias+ReLU run in bf16
        w2.astype(jnp.bfloat16),
        b2.astype(jnp.bfloat16),
        w3.astype(jnp.bfloat16),
        b3.astype(jnp.float32),    # final bias added to the f32 accumulator
    )


def _reference_forward(z_t, params):
    w1, b1, w2, b2, w3, b3 = params
    h1 = jnp.maximum(z_t @ w1 + b1, 0.0)
    h2 = jnp.maximum(h1 @ w2 + b2, 0.0)
    return h2 @ w3 + b3


if __name__ == "__main__":
    latent_dim = 32
    batch = 8

    key = jax.random.PRNGKey(0)
    k_params, k_z, k_t = jax.random.split(key, 3)

    params_f32 = init_noise_predictor_params(k_params, latent_dim)
    kernel_params = prepare_noise_predictor_params(params_f32)

    z_t = jax.random.normal(k_z, (batch, latent_dim), jnp.float32)
    t = jax.random.randint(k_t, (batch,), 0, 1000)  # unused by the module's forward

    out = noise_predictor_forward(z_t, t, kernel_params)
    out = jax.block_until_ready(out)

    ref = _reference_forward(z_t, params_f32)
    assert out.shape == (batch, latent_dim)
    assert out.dtype == jnp.float32
    # bf16 MXU path (f32 accumulation) + bf16 hidden-layer epilogues ->
    # loosened tolerance vs. the f32 reference.
    assert jnp.allclose(out, ref, atol=5e-2, rtol=5e-2), "mismatch vs JAX reference"

    print("KERNEL_OK")
</pallas_src>

<mosaic_0001>
module attributes {stable_mosaic.version = 11 : i64} {
  func.func @_mlp_kernel(%arg0: i32, %arg1: memref<8x32xf32, #tpu.memory_space<vmem>>, %arg2: memref<32x512xbf16, #tpu.memory_space<vmem>>, %arg3: memref<1x512xbf16, #tpu.memory_space<vmem>>, %arg4: memref<512x512xbf16, #tpu.memory_space<vmem>>, %arg5: memref<1x512xbf16, #tpu.memory_space<vmem>>, %arg6: memref<512x32xbf16, #tpu.memory_space<vmem>>, %arg7: memref<1x32xf32, #tpu.memory_space<vmem>>, %arg8: memref<8x32xf32, #tpu.memory_space<vmem>>) attributes {dimension_semantics = [#tpu.dimension_semantics<parallel>], iteration_bounds = array<i64: 1>, scalar_prefetch = 0 : i64, scratch_operands = 0 : i64, tpu.core_type = #tpu.core_type<tc>, window_params = [{transform_indices = @transform_0, window_bounds = array<i64: 8, 32>}, {pipeline_mode = #tpu.pipeline_mode<synchronous>, transform_indices = @transform_1, window_bounds = array<i64: 32, 512>}, {pipeline_mode = #tpu.pipeline_mode<synchronous>, transform_indices = @transform_2, window_bounds = array<i64: 1, 512>}, {pipeline_mode = #tpu.pipeline_mode<synchronous>, transform_indices = @transform_3, window_bounds = array<i64: 512, 512>}, {pipeline_mode = #tpu.pipeline_mode<synchronous>, transform_indices = @transform_4, window_bounds = array<i64: 1, 512>}, {pipeline_mode = #tpu.pipeline_mode<synchronous>, transform_indices = @transform_5, window_bounds = array<i64: 512, 32>}, {pipeline_mode = #tpu.pipeline_mode<synchronous>, transform_indices = @transform_6, window_bounds = array<i64: 1, 32>}, {transform_indices = @transform_7, window_bounds = array<i64: 8, 32>}]} {
    %c0 = arith.constant 0 : index
    %c0_0 = arith.constant 0 : index
    %0 = vector.load %arg1[%c0, %c0_0] : memref<8x32xf32, #tpu.memory_space<vmem>>, vector<8x32xf32>
    %1 = arith.truncf %0 : vector<8x32xf32> to vector<8x32xbf16>
    %c0_1 = arith.constant 0 : index
    %c0_2 = arith.constant 0 : index
    %2 = vector.load %arg2[%c0_1, %c0_2] : memref<32x512xbf16, #tpu.memory_space<vmem>>, vector<32x512xbf16>
    %cst = arith.constant dense<0.000000e+00> : vector<8x512xf32>
    %3 = tpu.matmul %1, %2, %cst {dimension_numbers = #tpu.dot_dimension_numbers<[1], [0], [0], [1], [0, 0, 1, 1], [], []>} : vector<8x32xbf16>, vector<32x512xbf16>, vector<8x512xf32> -> vector<8x512xf32>
    %4 = arith.truncf %3 : vector<8x512xf32> to vector<8x512xbf16>
    %c0_3 = arith.constant 0 : index
    %c0_4 = arith.constant 0 : index
    %5 = vector.load %arg3[%c0_3, %c0_4] : memref<1x512xbf16, #tpu.memory_space<vmem>>, vector<1x512xbf16>
    %6 = vector.broadcast %5 : vector<1x512xbf16> to vector<8x512xbf16>
    %7 = arith.addf %4, %6 : vector<8x512xbf16>
    %cst_5 = arith.constant 0.000000e+00 : bf16
    %8 = vector.broadcast %cst_5 : bf16 to vector<8x512xbf16>
    %9 = arith.maximumf %7, %8 : vector<8x512xbf16>
    %c0_6 = arith.constant 0 : index
    %c0_7 = arith.constant 0 : index
    %10 = vector.load %arg4[%c0_6, %c0_7] : memref<512x512xbf16, #tpu.memory_space<vmem>>, vector<512x512xbf16>
    %cst_8 = arith.constant dense<0.000000e+00> : vector<8x512xf32>
    %11 = tpu.matmul %9, %10, %cst_8 {dimension_numbers = #tpu.dot_dimension_numbers<[1], [0], [0], [1], [0, 0, 1, 1], [], []>} : vector<8x512xbf16>, vector<512x512xbf16>, vector<8x512xf32> -> vector<8x512xf32>
    %12 = arith.truncf %11 : vector<8x512xf32> to vector<8x512xbf16>
    %c0_9 = arith.constant 0 : index
    %c0_10 = arith.constant 0 : index
    %13 = vector.load %arg5[%c0_9, %c0_10] : memref<1x512xbf16, #tpu.memory_space<vmem>>, vector<1x512xbf16>
    %14 = vector.broadcast %13 : vector<1x512xbf16> to vector<8x512xbf16>
    %15 = arith.addf %12, %14 : vector<8x512xbf16>
    %cst_11 = arith.constant 0.000000e+00 : bf16
    %16 = vector.broadcast %cst_11 : bf16 to vector<8x512xbf16>
    %17 = arith.maximumf %15, %16 : vector<8x512xbf16>
    %c0_12 = arith.constant 0 : index
    %c0_13 = arith.constant 0 : index
    %18 = vector.load %arg6[%c0_12, %c0_13] : memref<512x32xbf16, #tpu.memory_space<vmem>>, vector<512x32xbf16>
    %cst_14 = arith.constant dense<0.000000e+00> : vector<8x32xf32>
    %19 = tpu.matmul %17, %18, %cst_14 {dimension_numbers = #tpu.dot_dimension_numbers<[1], [0], [0], [1], [0, 0, 1, 1], [], []>} : vector<8x512xbf16>, vector<512x32xbf16>, vector<8x32xf32> -> vector<8x32xf32>
    %c0_15 = arith.constant 0 : index
    %c0_16 = arith.constant 0 : index
    %20 = vector.load %arg7[%c0_15, %c0_16] : memref<1x32xf32, #tpu.memory_space<vmem>>, vector<1x32xf32>
    %21 = vector.broadcast %20 : vector<1x32xf32> to vector<8x32xf32>
    %22 = arith.addf %19, %21 : vector<8x32xf32>
    %c0_17 = arith.constant 0 : index
    %c0_18 = arith.constant 0 : index
    %23 = vector.load %arg8[%c0_17, %c0_18] : memref<8x32xf32, #tpu.memory_space<vmem>>, vector<8x32xf32>
    tpu.vector_store %arg8[%c0_17, %c0_18], %22 {strides = array<i32>} : memref<8x32xf32, #tpu.memory_space<vmem>>, vector<8x32xf32>,
    return
  }
  func.func @transform_0(%arg0: i32) -> (i32, i32) {
    %c0_i32 = arith.constant 0 : i32
    %c0_i32_0 = arith.constant 0 : i32
    return %arg0, %c0_i32 : i32, i32
  }
  func.func @transform_1(%arg0: i32) -> (i32, i32) {
    %c0_i32 = arith.constant 0 : i32
    %c0_i32_0 = arith.constant 0 : i32
    %c0_i32_1 = arith.constant 0 : i32
    return %c0_i32, %c0_i32_0 : i32, i32
  }
  func.func @transform_2(%arg0: i32) -> (i32, i32) {
    %c0_i32 = arith.constant 0 : i32
    %c0_i32_0 = arith.constant 0 : i32
    %c0_i32_1 = arith.constant 0 : i32
    return %c0_i32, %c0_i32_0 : i32, i32
  }
  func.func @transform_3(%arg0: i32) -> (i32, i32) {
    %c0_i32 = arith.constant 0 : i32
    %c0_i32_0 = arith.constant 0 : i32
    %c0_i32_1 = arith.constant 0 : i32
    return %c0_i32, %c0_i32_0 : i32, i32
  }
  func.func @transform_4(%arg0: i32) -> (i32, i32) {
    %c0_i32 = arith.constant 0 : i32
    %c0_i32_0 = arith.constant 0 : i32
    %c0_i32_1 = arith.constant 0 : i32
    return %c0_i32, %c0_i32_0 : i32, i32
  }
  func.func @transform_5(%arg0: i32) -> (i32, i32) {
    %c0_i32 = arith.constant 0 : i32
    %c0_i32_0 = arith.constant 0 : i32
    %c0_i32_1 = arith.constant 0 : i32
    return %c0_i32, %c0_i32_0 : i32, i32
  }
  func.func @transform_6(%arg0: i32) -> (i32, i32) {
    %c0_i32 = arith.constant 0 : i32
    %c0_i32_0 = arith.constant 0 : i32
    %c0_i32_1 = arith.constant 0 : i32
    return %c0_i32, %c0_i32_0 : i32, i32
  }
  func.func @transform_7(%arg0: i32) -> (i32, i32) {
    %c0_i32 = arith.constant 0 : i32
    %c0_i32_0 = arith.constant 0 : i32
    return %arg0, %c0_i32 : i32, i32
  }
}

</mosaic_0001>

<bundles_post_ra>
// kernel: noise_predictor_forward.1
= control target key start
LH: loop header
LB: loop body
LE: loop exit
PB: predicated region body
PF: predicated region fallthrough
CT: control target
= control target key end

     0   :  { %12 = vsyncpa [#allocation3], 0  ;;  %s2357_s0 = inlined_call_operand.vmem [shape: f32[8,32], index: 0, kind: input, shape index: {}]   ;;  %s2358_s1 = inlined_call_operand.vmem [shape: bf16[32,512], index: 1, kind: input, shape index: {}]   ;;  %s2359_s2 = inlined_call_operand.vmem [shape: bf16[1,512], index: 2, kind: input, shape index: {}]   ;;  %s2360_s3 = inlined_call_operand.hbm [shape: bf16[512,512], index: 3, kind: input, shape index: {}]   ;;  %s2361_s4 = inlined_call_operand.vmem [shape: bf16[1,512], index: 4, kind: input, shape index: {}]   ;;  %s2362_s5 = inlined_call_operand.vmem [shape: bf16[512,32], index: 5, kind: input, shape index: {}]   ;;  %s2363_s6 = inlined_call_operand.vmem [shape: f32[1,32], index: 6, kind: input, shape index: {}]   ;;  %s2364_s7 = inlined_call_operand.hbm [shape: f32[8,32], index: 7, kind: output, shape index: {}]  }
   0x1   :  { %13 = vsyncpa [#allocation4], 0  ;;  %s2116_s24 = smov [#allocation2]   ;;  %s2068_s28 = scalar_lea.hbm %s2360_s3, 16384 }
   0x2   :  { %s25_s25 = sshll.u32 %s2116_s24, 4  ;;  %p2069_p0 = scmp.ne.s32.totalorder %s2360_s3, %s2068_s28  ;;  %s26_s25 = int_to_ptr.vmem [resolvable:$true] %s25_s25 }
   0x3   :  { %p2072_p1 = scmp.lt.u32.totalorder %s2068_s28, %s2360_s3 }
   0x5   :  { %p2074_p2 = pnand %p2072_p1, %p2069_p0 }
   0x7   :  { %2077 = shalt.err (!%p2074_p2)
}
   0x8   :  { %s2078_s10 = scalar_lea.vmem %s26_s25, 16384  ;;  %p2083_p4 = scmp.lt.s32.totalorder %s26_s25, %s26_s25 }
   0x9   :  { %p2079_p3 = scmp.ne.s32.totalorder %s26_s25, %s2078_s10  ;;  %p2084_p5 = scmp.lt.s32.totalorder %s2078_s10, %s2078_s10 }
   0xb   :  { %p2085_p6 = por %p2084_p5, %p2083_p4 }
   0xd   :  { %p2086_p7 = pnand %p2085_p6, %p2079_p3 }
   0xf   :  { %2089 = shalt.err (!%p2086_p7)
}
  0x10   :  { %s2117_s11 = smov 256   ;;  %s2118_s12 = smov 16  }
  0x11   :  { %31 = dma.hbm_to_vmem [thread:$0]  %s2360_s3, 16384, %s26_s25, [#allocation3], %s2117_s11, %s2117_s11, %s2118_s12  }
  0x12   :  { %2112 = dma.done.wait [#allocation3], 16384  }
  0x13   :  { %2113 = vsyncadd [#allocation3], 4294950912  ;;  %v2119_v0 = vmov 0   ;;  %v1832_v1 = vld [vmem:[%s2358_s1 + $0x4] ss:$16 sps:$4 sm:$0xff]   ;;  %vm92_vm0 = vcmask 261120  }
  0x14   :  { %128 = vmatprep.mubr.bf16.mxu0 %v2119_v0  ;;  %169 = vmatprep.mubr.bf16.mxu1 %v2119_v0  ;;  %v1834_v2 = vld [vmem:[%s2358_s1] ss:$16 sps:$4 sm:$0xff]   ;;  %v1835_v3 = vld [vmem:[%s2358_s1 + $0x24] ss:$16 sps:$4 sm:$0xff]   ;;  %v1838_v6 = vld [vmem:[%s2358_s1 + $0xc] ss:$16 sps:$4 sm:$0xff]  }
  0x15   :  { %96 = vmatprep.subr.bf16.mxu0 %v1832_v1  ;;  %v1837_v4 = vld [vmem:[%s2358_s1 + $0x20] ss:$16 sps:$4 sm:$0xff]   ;;  %v1840_v7 = vld [vmem:[%s2358_s1 + $0x8] ss:$16 sps:$4 sm:$0xff]   ;;  %137 = vmatprep.subr.bf16.mxu1 %v1838_v6  ;;  %v1841_v8 = vld [vmem:[%s2358_s1 + $0x2c] ss:$16 sps:$4 sm:$0xff]  }
  0x16   :  { %v42_v5 = vld [vmem:[%s2357_s0] sm:$0xff]  ;;  %97 = vmatpush1.bf16.msra.mxu0 %v1834_v2  ;;  %138 = vmatpush1.bf16.msra.mxu1 %v1840_v7  ;;  %v1843_v10 = vld [vmem:[%s2358_s1 + $0x28] ss:$16 sps:$4 sm:$0xff]   ;;  %v1849_v13 = vld [vmem:[#allocation2 + $0xc] ss:$16 sps:$4 sm:$0xff]   ;;  %s2121_s20 = smov [#allocation5]  }
  0x17   :  { %98 = vmatprep.subr.bf16.mxu0 %v1835_v3  ;;  %v43_v9 = vpack.c.bf16 %v42_v5, %v42_v5  ;;  %v1846_v11 = vld [vmem:[#allocation2 + $0x4] ss:$16 sps:$4 sm:$0xff]   ;;  %139 = vmatprep.subr.bf16.mxu1 %v1841_v8  ;;  %v1844_v12 = vld [vmem:[#allocation2] ss:$16 sps:$4 sm:$0xff]   ;;  %v1847_v15 = vld [vmem:[#allocation2 + $0x8] ss:$16 sps:$4 sm:$0xff]  }
  0x18   :  { %v1852_v14 = vld [vmem:[#allocation2 + $0x24] ss:$16 sps:$4 sm:$0xff]   ;;  %v1850_v16 = vld [vmem:[#allocation2 + $0x20] ss:$16 sps:$4 sm:$0xff]   ;;  %v1855_v17 = vld [vmem:[#allocation2 + $0x2c] ss:$16 sps:$4 sm:$0xff]  }
  0x19   :  { %v1858_v18 = vld [vmem:[#allocation2 + $0x44] ss:$16 sps:$4 sm:$0xff]   ;;  %v1853_v19 = vld [vmem:[#allocation2 + $0x28] ss:$16 sps:$4 sm:$0xff]   ;;  %v1856_v20 = vld [vmem:[#allocation2 + $0x40] ss:$16 sps:$4 sm:$0xff]  }
  0x1a   :  { %99 = vmatpush1.bf16.msra.mxu0 %v1837_v4  ;;  %140 = vmatpush1.bf16.msra.mxu1 %v1843_v10  ;;  %v1861_v21 = vld [vmem:[#allocation2 + $0x4c] ss:$16 sps:$4 sm:$0xff]   ;;  %v1864_v22 = vld [vmem:[#allocation2 + $0x64] ss:$16 sps:$4 sm:$0xff]   ;;  %v1859_v23 = vld [vmem:[#allocation2 + $0x48] ss:$16 sps:$4 sm:$0xff]  }
  0x1b   :  { %1012 = vmatprep.subr.bf16.mxu0 %v1846_v11  ;;  %1094 = vmatprep.subr.bf16.mxu1 %v1849_v13  ;;  %v1862_v24 = vld [vmem:[#allocation2 + $0x60] ss:$16 sps:$4 sm:$0xff]   ;;  %v1867_v25 = vld [vmem:[#allocation2 + $0x6c] ss:$16 sps:$4 sm:$0xff]   ;;  %v1870_v26 = vld [vmem:[#allocation2 + $0x84] ss:$16 sps:$4 sm:$0xff]  }
  0x1c   :  { %v1865_v27 = vld [vmem:[#allocation2 + $0x68] ss:$16 sps:$4 sm:$0xff]   ;;  %v1868_v28 = vld [vmem:[#allocation2 + $0x80] ss:$16 sps:$4 sm:$0xff]   ;;  %v1873_v29 = vld [vmem:[#allocation2 + $0x8c] ss:$16 sps:$4 sm:$0xff]  }
  0x1d   :  { %1609 = vmatmul.mubr.msk.bf16.vlgmr.msra.gmra.mrb[0].mxu0 %vm92_vm0, %v43_v9  ;;  %1610 = vmatmul.mubr.msk.bf16.vlgmr.msra.gmra.mrb[0].mxu1 %vm92_vm0, %v43_v9  ;;  %v1876_v30 = vld [vmem:[#allocation2 + $0xa4] ss:$16 sps:$4 sm:$0xff]   ;;  %v1871_v31 = vld [vmem:[#allocation2 + $0x88] ss:$16 sps:$4 sm:$0xff]   ;;  %v1874_v32 = vld [vmem:[#allocation2 + $0xa0] ss:$16 sps:$4 sm:$0xff]  }
  0x1e   :  { %1013 = vmatpush1.bf16.msra.mxu0 %v1844_v12  ;;  %1095 = vmatpush1.bf16.msra.mxu1 %v1847_v15  ;;  %v1879_v33 = vld [vmem:[#allocation2 + $0xac] ss:$16 sps:$4 sm:$0xff]   ;;  %v1882_v34 = vld [vmem:[#allocation2 + $0xc4] ss:$16 sps:$4 sm:$0xff]   ;;  %v1877_v35 = vld [vmem:[#allocation2 + $0xa8] ss:$16 sps:$4 sm:$0xff]  }
  0x1f   :  { %1014 = vmatprep.subr.bf16.mxu0 %v1852_v14  ;;  %1096 = vmatprep.subr.bf16.mxu1 %v1855_v17  ;;  %v1880_v36 = vld [vmem:[#allocation2 + $0xc0] ss:$16 sps:$4 sm:$0xff]   ;;  %v1885_v37 = vld [vmem:[#allocation2 + $0xcc] ss:$16 sps:$4 sm:$0xff]   ;;  %v1888_v38 = vld [vmem:[#allocation2 + $0xe4] ss:$16 sps:$4 sm:$0xff]  }
  0x20   :  { %v1883_v39 = vld [vmem:[#allocation2 + $0xc8] ss:$16 sps:$4 sm:$0xff]   ;;  %v1886_v40 = vld [vmem:[#allocation2 + $0xe0] ss:$16 sps:$4 sm:$0xff]   ;;  %v1891_v41 = vld [vmem:[#allocation2 + $0xec] ss:$16 sps:$4 sm:$0xff]  }
  0x21   :  { %v1894_v42 = vld [vmem:[#allocation2 + $0x104] ss:$16 sps:$4 sm:$0xff]   ;;  %v1889_v43 = vld [vmem:[#allocation2 + $0xe8] ss:$16 sps:$4 sm:$0xff]   ;;  %v1892_v44 = vld [vmem:[#allocation2 + $0x100] ss:$16 sps:$4 sm:$0xff]  }
  0x22   :  { %1015 = vmatpush1.bf16.msra.mxu0 %v1850_v16  ;;  %1097 = vmatpush1.bf16.msra.mxu1 %v1853_v19  ;;  %v1897_v45 = vld [vmem:[#allocation2 + $0x10c] ss:$16 sps:$4 sm:$0xff]   ;;  %v1900_v46 = vld [vmem:[#allocation2 + $0x124] ss:$16 sps:$4 sm:$0xff]   ;;  %v1895_v47 = vld [vmem:[#allocation2 + $0x108] ss:$16 sps:$4 sm:$0xff]   ;;  %v195_v16 = vlaneseq }
  0x23   :  { %1016 = vmatprep.subr.bf16.mxu0 %v1858_v18  ;;  %1098 = vmatprep.subr.bf16.mxu1 %v1861_v21  ;;  %v1898_v48 = vld [vmem:[#allocation2 + $0x120] ss:$16 sps:$4 sm:$0xff]   ;;  %v1903_v49 = vld [vmem:[#allocation2 + $0x12c] ss:$16 sps:$4 sm:$0xff]   ;;  %v1906_v50 = vld [vmem:[#allocation2 + $0x144] ss:$16 sps:$4 sm:$0xff]  }
  0x24   :  { %v1901_v51 = vld [vmem:[#allocation2 + $0x128] ss:$16 sps:$4 sm:$0xff]   ;;  %v1904_v52 = vld [vmem:[#allocation2 + $0x140] ss:$16 sps:$4 sm:$0xff]   ;;  %v1909_v53 = vld [vmem:[#allocation2 + $0x14c] ss:$16 sps:$4 sm:$0xff]  }
  0x25   :  { %v1912_v54 = vld [vmem:[#allocation2 + $0x164] ss:$16 sps:$4 sm:$0xff]   ;;  %v1907_v55 = vld [vmem:[#allocation2 + $0x148] ss:$16 sps:$4 sm:$0xff]   ;;  %v1910_v56 = vld [vmem:[#allocation2 + $0x160] ss:$16 sps:$4 sm:$0xff]  }
  0x26   :  { %1017 = vmatpush1.bf16.msra.mxu0 %v1856_v20  ;;  %1099 = vmatpush1.bf16.msra.mxu1 %v1859_v23  ;;  %v1915_v57 = vld [vmem:[#allocation2 + $0x16c] ss:$16 sps:$4 sm:$0xff]   ;;  %v1918_v58 = vld [vmem:[#allocation2 + $0x184] ss:$16 sps:$4 sm:$0xff]   ;;  %v1913_v59 = vld [vmem:[#allocation2 + $0x168] ss:$16 sps:$4 sm:$0xff]  }
  0x27   :  { %1018 = vmatprep.subr.bf16.mxu0 %v1864_v22  ;;  %1100 = vmatprep.subr.bf16.mxu1 %v1867_v25  ;;  %v1916_v60 = vld [vmem:[#allocation2 + $0x180] ss:$16 sps:$4 sm:$0xff]   ;;  %v1921_v61 = vld [vmem:[#allocation2 + $0x18c] ss:$16 sps:$4 sm:$0xff]   ;;  %v1924_v62 = vld [vmem:[#allocation2 + $0x1a4] ss:$16 sps:$4 sm:$0xff]  }
  0x28   :  { %v1919_v63 = vld [vmem:[#allocation2 + $0x188] ss:$16 sps:$4 sm:$0xff]   ;;  %v1922_v1 = vld [vmem:[#allocation2 + $0x1a0] ss:$16 sps:$4 sm:$0xff]   ;;  %v1927_v2 = vld [vmem:[#allocation2 + $0x1ac] ss:$16 sps:$4 sm:$0xff]  }
  0x29   :  { %v1925_v3 = vld [vmem:[#allocation2 + $0x1a8] ss:$16 sps:$4 sm:$0xff]   ;;  %v1930_v4 = vld [vmem:[#allocation2 + $0x1c4] ss:$16 sps:$4 sm:$0xff]   ;;  %v1933_v5 = vld [vmem:[#allocation2 + $0x1cc] ss:$16 sps:$4 sm:$0xff]  }
  0x2a   :  { %1019 = vmatpush1.bf16.msra.mxu0 %v1862_v24  ;;  %1101 = vmatpush1.bf16.msra.mxu1 %v1865_v27  ;;  %v1928_v6 = vld [vmem:[#allocation2 + $0x1c0] ss:$16 sps:$4 sm:$0xff]   ;;  %v1931_v7 = vld [vmem:[#allocation2 + $0x1c8] ss:$16 sps:$4 sm:$0xff]   ;;  %v1936_v8 = vld [vmem:[#allocation2 + $0x1e4] ss:$16 sps:$4 sm:$0xff]  }
  0x2b   :  { %1020 = vmatprep.subr.bf16.mxu0 %v1870_v26  ;;  %1102 = vmatprep.subr.bf16.mxu1 %v1873_v29  ;;  %v1939_v9 = vld [vmem:[#allocation2 + $0x1ec] ss:$16 sps:$4 sm:$0xff]   ;;  %v1934_v10 = vld [vmem:[#allocation2 + $0x1e0] ss:$16 sps:$4 sm:$0xff]   ;;  %v1937_v11 = vld [vmem:[#allocation2 + $0x1e8] ss:$16 sps:$4 sm:$0xff]  }
  0x2c   :  { %v1942_v12 = vld [vmem:[#allocation2 + $0x204] ss:$16 sps:$4 sm:$0xff]   ;;  %v1945_v13 = vld [vmem:[#allocation2 + $0x20c] ss:$16 sps:$4 sm:$0xff]   ;;  %v2120_v14 = vmov 1966171168  }
  0x2d   :  { %v193_v15 = vunpack.c.l.s4 %v2120_v14  ;;  %v196_v18 = vshrl.u32 %v195_v16, 7  ;;  %v1611_v19 = vld.sshfl [vmem:[%s2359_s2] sm:$0x33 pattern:$0x75316420]  ;;  %s1592_s3 = sshll.u32 %s2121_s20, 4  ;;  %s1593_s3 = int_to_ptr.vmem [resolvable:$true] %s1592_s3 }
  0x2e   :  { %1021 = vmatpush1.bf16.msra.mxu0 %v1868_v28  ;;  %1103 = vmatpush1.bf16.msra.mxu1 %v1871_v31  ;;  %v191_v21 = vcombine.high %v1611_v19, %v1611_v19  ;;  %v1982_v14 = vld [vmem:[#allocation2 + $0x2e0] ss:$16 sps:$4 sm:$0xff]   ;;  %v1990_v16 = vld [vmem:[#allocation2 + $0x304] ss:$16 sps:$4 sm:$0xff]   ;;  %s2090_s21 = scalar_lea.vmem %s1593_s3, 128  ;;  %p2095_p9 = scmp.lt.s32.totalorder %s1593_s3, %s1593_s3 }
  0x2f   :  { %1022 = vmatprep.subr.bf16.mxu0 %v1876_v30  ;;  %1104 = vmatprep.subr.bf16.mxu1 %v1879_v33  ;;  %v194_v17 = vunpack.c.0.s8 %v193_v15  ;;  %v2216_v25 = vsub.s32 0, %v196_v18  ;;  %v1985_v15 = vld [vmem:[#allocation2 + $0x2e8] ss:$16 sps:$4 sm:$0xff]   ;;  %p2091_p8 = scmp.ne.s32.totalorder %s1593_s3, %s2090_s21  ;;  %p2096_p10 = scmp.lt.s32.totalorder %s2090_s21, %s2090_s21 }
  0x31   :  { %v2208_v20 = vsub.s32 %v194_v17, %v196_v18  ;;  %v1993_v17 = vld [vmem:[#allocation2 + $0x30c] ss:$16 sps:$4 sm:$0xff]   ;;  %v1988_v18 = vld [vmem:[#allocation2 + $0x300] ss:$16 sps:$4 sm:$0xff]   ;;  %p2097_p11 = por %p2096_p10, %p2095_p9 }
  0x32   :  { %1023 = vmatpush1.bf16.msra.mxu0 %v1874_v32  ;;  %1105 = vmatpush1.bf16.msra.mxu1 %v1877_v35 }
  0x33   :  { %1024 = vmatprep.subr.bf16.mxu0 %v1882_v34  ;;  %1106 = vmatprep.subr.bf16.mxu1 %v1885_v37  ;;  %v2211_v22 = vrot.slane %v1611_v19, %v2208_v20  ;;  %v205_v23 = vrot.slane %v191_v21, %v2208_v20  ;;  %v1991_v19 = vld [vmem:[#allocation2 + $0x308] ss:$16 sps:$4 sm:$0xff]   ;;  %v1996_v21 = vld [vmem:[#allocation2 + $0x324] ss:$16 sps:$4 sm:$0xff]   ;;  %p2098_p12 = pnand %p2097_p11, %p2091_p8 }
  0x35   :  { %v209_v24 = vpack.i.b16 %v2211_v22, %v2211_v22  ;;  %v207_v26 = vcombine.high %v205_v23, %v205_v23  ;;  %v216_v27 = vpack.i.b16 %v205_v23, %v205_v23  ;;  %v1999_v23 = vld [vmem:[#allocation2 + $0x32c] ss:$16 sps:$4 sm:$0xff]  }
  0x36   :  { %1025 = vmatpush1.bf16.msra.mxu0 %v1880_v36  ;;  %1107 = vmatpush1.bf16.msra.mxu1 %v1883_v39 }
  0x37   :  { %1026 = vmatprep.subr.bf16.mxu0 %v1888_v38  ;;  %1108 = vmatprep.subr.bf16.mxu1 %v1891_v41  ;;  %v214_v28 = vrot.slane %v209_v24, %v2216_v25  ;;  %v230_v29 = vpack.i.b16 %v207_v26, %v207_v26  ;;  %v221_v31 = vrot.slane %v216_v27, %v2216_v25  ;;  %v1994_v24 = vld [vmem:[#allocation2 + $0x320] ss:$16 sps:$4 sm:$0xff]   ;;  %v1997_v26 = vld [vmem:[#allocation2 + $0x328] ss:$16 sps:$4 sm:$0xff]   ;;  %v2002_v27 = vld [vmem:[#allocation2 + $0x344] ss:$16 sps:$4 sm:$0xff]  }
  0x39   :  { %v235_v39 = vrot.slane %v230_v29, %v2216_v25  ;;  %v2000_v29 = vld [vmem:[#allocation2 + $0x340] ss:$16 sps:$4 sm:$0xff]  }
  0x3a   :  { %1027 = vmatpush1.bf16.msra.mxu0 %v1886_v40  ;;  %1109 = vmatpush1.bf16.msra.mxu1 %v1889_v43 }
  0x3b   :  { %1028 = vmatprep.subr.bf16.mxu0 %v1894_v42  ;;  %1110 = vmatprep.subr.bf16.mxu1 %v1897_v45  ;;  %v1940_v45 = vld [vmem:[#allocation2 + $0x200] ss:$16 sps:$4 sm:$0xff]  }
  0x3e   :  { %1029 = vmatpush1.bf16.msra.mxu0 %v1892_v44  ;;  %1111 = vmatpush1.bf16.msra.mxu1 %v1895_v47 }
  0x3f   :  { %1030 = vmatprep.subr.bf16.mxu0 %v1900_v46  ;;  %1112 = vmatprep.subr.bf16.mxu1 %v1903_v49  ;;  %v1943_v46 = vld [vmem:[#allocation2 + $0x208] ss:$16 sps:$4 sm:$0xff]   ;;  %v1948_v49 = vld [vmem:[#allocation2 + $0x224] ss:$16 sps:$4 sm:$0xff]  }
  0x42   :  { %1031 = vmatpush1.bf16.msra.mxu0 %v1898_v48  ;;  %1113 = vmatpush1.bf16.msra.mxu1 %v1901_v51 }
  0x43   :  { %1032 = vmatprep.subr.bf16.mxu0 %v1906_v50  ;;  %1114 = vmatprep.subr.bf16.mxu1 %v1909_v53  ;;  %v1951_v50 = vld [vmem:[#allocation2 + $0x22c] ss:$16 sps:$4 sm:$0xff]   ;;  %v1946_v53 = vld [vmem:[#allocation2 + $0x220] ss:$16 sps:$4 sm:$0xff]  }
  0x46   :  { %1033 = vmatpush1.bf16.msra.mxu0 %v1904_v52  ;;  %1115 = vmatpush1.bf16.msra.mxu1 %v1907_v55  ;;  %v1954_v55 = vld [vmem:[#allocation2 + $0x244] ss:$16 sps:$4 sm:$0xff]  }
  0x47   :  { %1034 = vmatprep.subr.bf16.mxu0 %v1912_v54  ;;  %1116 = vmatprep.subr.bf16.mxu1 %v1915_v57  ;;  %v1949_v54 = vld [vmem:[#allocation2 + $0x228] ss:$16 sps:$4 sm:$0xff]   ;;  %v1952_v57 = vld [vmem:[#allocation2 + $0x240] ss:$16 sps:$4 sm:$0xff]  }
  0x4a   :  { %1035 = vmatpush1.bf16.msra.mxu0 %v1910_v56  ;;  %1117 = vmatpush1.bf16.msra.mxu1 %v1913_v59  ;;  %v1957_v56 = vld [vmem:[#allocation2 + $0x24c] ss:$16 sps:$4 sm:$0xff]   ;;  %v1960_v59 = vld [vmem:[#allocation2 + $0x264] ss:$16 sps:$4 sm:$0xff]  }
  0x4b   :  { %1036 = vmatprep.subr.bf16.mxu0 %v1918_v58  ;;  %1118 = vmatprep.subr.bf16.mxu1 %v1921_v61  ;;  %v1955_v58 = vld [vmem:[#allocation2 + $0x248] ss:$16 sps:$4 sm:$0xff]   ;;  %v1958_v61 = vld [vmem:[#allocation2 + $0x260] ss:$16 sps:$4 sm:$0xff]  }
  0x4e   :  { %1037 = vmatpush1.bf16.msra.mxu0 %v1916_v60  ;;  %1119 = vmatpush1.bf16.msra.mxu1 %v1919_v63  ;;  %v1963_v60 = vld [vmem:[#allocation2 + $0x26c] ss:$16 sps:$4 sm:$0xff]   ;;  %v1966_v63 = vld [vmem:[#allocation2 + $0x284] ss:$16 sps:$4 sm:$0xff]  }
  0x4f   :  { %1038 = vmatprep.subr.bf16.mxu0 %v1924_v62  ;;  %1120 = vmatprep.subr.bf16.mxu1 %v1927_v2  ;;  %v1961_v62 = vld [vmem:[#allocation2 + $0x268] ss:$16 sps:$4 sm:$0xff]   ;;  %v1964_v2 = vld [vmem:[#allocation2 + $0x280] ss:$16 sps:$4 sm:$0xff]  }
  0x52   :  { %1039 = vmatpush1.bf16.msra.mxu0 %v1922_v1  ;;  %1121 = vmatpush1.bf16.msra.mxu1 %v1925_v3  ;;  %v1969_v1 = vld [vmem:[#allocation2 + $0x28c] ss:$16 sps:$4 sm:$0xff]   ;;  %v1967_v3 = vld [vmem:[#allocation2 + $0x288] ss:$16 sps:$4 sm:$0xff]  }
  0x53   :  { %1040 = vmatprep.subr.bf16.mxu0 %v1930_v4  ;;  %1122 = vmatprep.subr.bf16.mxu1 %v1933_v5  ;;  %v1972_v4 = vld [vmem:[#allocation2 + $0x2a4] ss:$16 sps:$4 sm:$0xff]   ;;  %v1975_v5 = vld [vmem:[#allocation2 + $0x2ac] ss:$16 sps:$4 sm:$0xff]  }
  0x56   :  { %1041 = vmatpush1.bf16.msra.mxu0 %v1928_v6  ;;  %1123 = vmatpush1.bf16.msra.mxu1 %v1931_v7  ;;  %v1970_v6 = vld [vmem:[#allocation2 + $0x2a0] ss:$16 sps:$4 sm:$0xff]   ;;  %v1973_v7 = vld [vmem:[#allocation2 + $0x2a8] ss:$16 sps:$4 sm:$0xff]  }
  0x57   :  { %1042 = vmatprep.subr.bf16.mxu0 %v1936_v8  ;;  %1124 = vmatprep.subr.bf16.mxu1 %v1939_v9  ;;  %v1978_v8 = vld [vmem:[#allocation2 + $0x2c4] ss:$16 sps:$4 sm:$0xff]   ;;  %v1981_v9 = vld [vmem:[#allocation2 + $0x2cc] ss:$16 sps:$4 sm:$0xff]  }
  0x5a   :  { %1043 = vmatpush1.bf16.msra.mxu0 %v1934_v10  ;;  %1125 = vmatpush1.bf16.msra.mxu1 %v1937_v11  ;;  %v1976_v10 = vld [vmem:[#allocation2 + $0x2c0] ss:$16 sps:$4 sm:$0xff]   ;;  %v1979_v11 = vld [vmem:[#allocation2 + $0x2c8] ss:$16 sps:$4 sm:$0xff]  }
  0x5b   :  { %1053 = vmatprep.subr.bf16.mxu0 %v1942_v12  ;;  %1135 = vmatprep.subr.bf16.mxu1 %v1945_v13  ;;  %v1984_v12 = vld [vmem:[#allocation2 + $0x2e4] ss:$16 sps:$4 sm:$0xff]   ;;  %v1987_v13 = vld [vmem:[#allocation2 + $0x2ec] ss:$16 sps:$4 sm:$0xff]  }
  0xf0   :  { %v130_v30 = vpop.f32.mrb[0].mxu0  ;;  %v2220_v38 = vpop.f32.mrb[0].mxu1 }
  0xf1   :  { %v178_v32 = vpack.c.bf16 %v130_v30, %v130_v30  ;;  %v132_v33 = vpop.f32.mrb[1].mxu0  ;;  %v173_v41 = vpop.f32.mrb[1].mxu1  ;;  %v2003_v30 = vld [vmem:[#allocation2 + $0x348] ss:$16 sps:$4 sm:$0xff]  }
  0xf2   :  { %v179_v34 = vpack.c.bf16 %v132_v33, %v132_v33  ;;  %v134_v35 = vpop.f32.mrb[2].mxu0  ;;  %v181_v42 = vpack.c.bf16 %v173_v41, %v173_v41  ;;  %v175_v43 = vpop.f32.mrb[2].mxu1  ;;  %v2006_v33 = vld [vmem:[#allocation2 + $0x360] ss:$16 sps:$4 sm:$0xff]   ;;  %v2020_v41 = vld [vmem:[#allocation2 + $0x3a4] ss:$16 sps:$4 sm:$0xff]  }
  0xf3   :  { %v236_v36 = vadd.bf16 %v214_v28, %v178_v32  ;;  %v135_v37 = vpop.f32.mrb[3].mxu0  ;;  %v176_v47 = vpop.f32.mrb[3].mxu1  ;;  %v2005_v28 = vld [vmem:[#allocation2 + $0x34c] ss:$16 sps:$4 sm:$0xff]   ;;  %v2014_v35 = vld [vmem:[#allocation2 + $0x384] ss:$16 sps:$4 sm:$0xff]  }
  0xf4   :  { %v237_v40 = vadd.bf16 %v221_v31, %v179_v34  ;;  %v239_v51 = vadd.bf16 %v235_v39, %v181_v42  ;;  %v2008_v31 = vld [vmem:[#allocation2 + $0x364] ss:$16 sps:$4 sm:$0xff]   ;;  %v2011_v32 = vld [vmem:[#allocation2 + $0x36c] ss:$16 sps:$4 sm:$0xff]   ;;  %v2009_v34 = vld [vmem:[#allocation2 + $0x368] ss:$16 sps:$4 sm:$0xff]  }
  0xf5   :  { %v240_v48 = vmax.bf16 %v2119_v0, %v236_v36  ;;  %v2017_v36 = vld [vmem:[#allocation2 + $0x38c] ss:$16 sps:$4 sm:$0xff]   ;;  %v2012_v37 = vld [vmem:[#allocation2 + $0x380] ss:$16 sps:$4 sm:$0xff]   ;;  %v2015_v39 = vld [vmem:[#allocation2 + $0x388] ss:$16 sps:$4 sm:$0xff]  }
  0xf6   :  { %v241_v44 = vmax.bf16 %v2119_v0, %v237_v40  ;;  %v243_v52 = vmax.bf16 %v2119_v0, %v239_v51  ;;  %v206_v40 = vcombine.high %v2211_v22, %v2211_v22  ;;  %v2023_v42 = vld [vmem:[#allocation2 + $0x3ac] ss:$16 sps:$4 sm:$0xff]   ;;  %v2018_v43 = vld [vmem:[#allocation2 + $0x3a0] ss:$16 sps:$4 sm:$0xff]   ;;  %v2032_v51 = vld [vmem:[#allocation2 + $0x3e4] ss:$16 sps:$4 sm:$0xff]  }
  0xf7   :  { %v2029_v47 = vld [vmem:[#allocation2 + $0x3cc] ss:$16 sps:$4 sm:$0xff]  }
  0xf8   :  { %1044 = vmatprep.mubr.bf16.mxu0 %v241_v44  ;;  %1126 = vmatprep.mubr.bf16.mxu1 %v241_v44  ;;  %v2021_v44 = vld [vmem:[#allocation2 + $0x3a8] ss:$16 sps:$4 sm:$0xff]  }
  0xf9   :  { %1045 = vmatmul.mubr.bf16.vlgmr.msra.gmra.mrb[4].mxu0 %v240_v48  ;;  %1127 = vmatmul.mubr.bf16.vlgmr.msra.gmra.mrb[4].mxu1 %v240_v48  ;;  %v2024_v48 = vld [vmem:[#allocation2 + $0x3c0] ss:$16 sps:$4 sm:$0xff]  }
  0xfa   :  { %1054 = vmatpush1.bf16.msra.mxu0 %v1940_v45  ;;  %1136 = vmatpush1.bf16.msra.mxu1 %v1943_v46  ;;  %v223_v45 = vpack.i.b16 %v206_v40, %v206_v40  ;;  %v2026_v46 = vld [vmem:[#allocation2 + $0x3c4] ss:$16 sps:$4 sm:$0xff]  }
  0xfb   :  { %1055 = vmatprep.subr.bf16.mxu0 %v1948_v49  ;;  %1137 = vmatprep.subr.bf16.mxu1 %v1951_v50  ;;  %v2027_v49 = vld [vmem:[#allocation2 + $0x3c8] ss:$16 sps:$4 sm:$0xff]   ;;  %v180_v50 = vpack.c.bf16 %v2220_v38, %v2220_v38  ;;  %v2037_v38 = vld [vmem:[%s2362_s5 + $0xc0] sm:$0xff]  }
  0xfc   :  { %1085 = vmatprep.mubr.bf16.mxu0 %v243_v52  ;;  %1167 = vmatprep.mubr.bf16.mxu1 %v243_v52  ;;  %v228_v22 = vrot.slane %v223_v45, %v2216_v25  ;;  %v2035_v52 = vld [vmem:[#allocation2 + $0x3ec] ss:$16 sps:$4 sm:$0xff]  }
  0xfe   :  { %1056 = vmatpush1.bf16.msra.mxu0 %v1946_v53  ;;  %1138 = vmatpush1.bf16.msra.mxu1 %v1949_v54  ;;  %v2030_v53 = vld [vmem:[#allocation2 + $0x3e0] ss:$16 sps:$4 sm:$0xff]   ;;  %v2033_v54 = vld [vmem:[#allocation2 + $0x3e8] ss:$16 sps:$4 sm:$0xff]  }
  0xff   :  { %1057 = vmatprep.subr.bf16.mxu0 %v1954_v55  ;;  %1139 = vmatprep.subr.bf16.mxu1 %v1957_v56  ;;  %v238_v55 = vadd.bf16 %v228_v22, %v180_v50  ;;  %v2036_v56 = vld [vmem:[%s2362_s5 + $0x40] sm:$0xff]  }
 0x102   :  { %1058 = vmatpush1.bf16.msra.mxu0 %v1952_v57  ;;  %1140 = vmatpush1.bf16.msra.mxu1 %v1955_v58  ;;  %v2038_v57 = vld [vmem:[%s2362_s5] sm:$0xff]  }
 0x103   :  { %1059 = vmatprep.subr.bf16.mxu0 %v1960_v59  ;;  %1141 = vmatprep.subr.bf16.mxu1 %v1963_v60  ;;  %v2039_v58 = vld [vmem:[%s2362_s5 + $0x80] sm:$0xff]   ;;  %v242_v59 = vmax.bf16 %v2119_v0, %v238_v55  ;;  %v2040_v60 = vld [vmem:[%s2362_s5 + $0x48] sm:$0xff]  }
 0x106   :  { %1060 = vmatpush1.bf16.msra.mxu0 %v1958_v61  ;;  %1142 = vmatpush1.bf16.msra.mxu1 %v1961_v62  ;;  %v2041_v61 = vld [vmem:[%s2362_s5 + $0xc8] sm:$0xff]  }
 0x107   :  { %1061 = vmatprep.subr.bf16.mxu0 %v1966_v63  ;;  %1143 = vmatprep.subr.bf16.mxu1 %v1969_v1  ;;  %v2042_v62 = vld [vmem:[%s2362_s5 + $0x8] sm:$0xff]   ;;  %v2044_v1 = vld [vmem:[%s2362_s5 + $0x50] sm:$0xff]  }
 0x108   :  { %v2043_v63 = vld [vmem:[%s2362_s5 + $0x88] sm:$0xff]  }
 0x10a   :  { %1062 = vmatpush1.bf16.msra.mxu0 %v1964_v2  ;;  %1144 = vmatpush1.bf16.msra.mxu1 %v1967_v3  ;;  %v2045_v2 = vld [vmem:[%s2362_s5 + $0xd0] sm:$0xff]  }
 0x10b   :  { %1063 = vmatprep.subr.bf16.mxu0 %v1972_v4  ;;  %1145 = vmatprep.subr.bf16.mxu1 %v1975_v5  ;;  %v2046_v3 = vld [vmem:[%s2362_s5 + $0x10] sm:$0xff]   ;;  %v2048_v5 = vld [vmem:[%s2362_s5 + $0x58] sm:$0xff]  }
 0x10c   :  { %v2047_v4 = vld [vmem:[%s2362_s5 + $0x90] sm:$0xff]  }
 0x10e   :  { %1064 = vmatpush1.bf16.msra.mxu0 %v1970_v6  ;;  %1146 = vmatpush1.bf16.msra.mxu1 %v1973_v7  ;;  %v2049_v6 = vld [vmem:[%s2362_s5 + $0xd8] sm:$0xff]  }
 0x10f   :  { %1065 = vmatprep.subr.bf16.mxu0 %v1978_v8  ;;  %1147 = vmatprep.subr.bf16.mxu1 %v1981_v9  ;;  %v2050_v7 = vld [vmem:[%s2362_s5 + $0x18] sm:$0xff]   ;;  %v2052_v9 = vld [vmem:[%s2362_s5 + $0x60] sm:$0xff]  }
 0x110   :  { %v2051_v8 = vld [vmem:[%s2362_s5 + $0x98] sm:$0xff]  }
 0x112   :  { %1066 = vmatpush1.bf16.msra.mxu0 %v1976_v10  ;;  %1148 = vmatpush1.bf16.msra.mxu1 %v1979_v11  ;;  %v2053_v10 = vld [vmem:[%s2362_s5 + $0xe0] sm:$0xff]  }
 0x113   :  { %1067 = vmatprep.subr.bf16.mxu0 %v1984_v12  ;;  %1149 = vmatprep.subr.bf16.mxu1 %v1987_v13  ;;  %v2054_v11 = vld [vmem:[%s2362_s5 + $0x20] sm:$0xff]   ;;  %v2056_v13 = vld [vmem:[%s2362_s5 + $0x68] sm:$0xff]  }
 0x114   :  { %v2055_v12 = vld [vmem:[%s2362_s5 + $0xa0] sm:$0xff]  }
 0x116   :  { %1068 = vmatpush1.bf16.msra.mxu0 %v1982_v14  ;;  %1150 = vmatpush1.bf16.msra.mxu1 %v1985_v15  ;;  %v2057_v14 = vld [vmem:[%s2362_s5 + $0xe8] sm:$0xff]  }
 0x117   :  { %1069 = vmatprep.subr.bf16.mxu0 %v1990_v16  ;;  %1151 = vmatprep.subr.bf16.mxu1 %v1993_v17  ;;  %v2058_v15 = vld [vmem:[%s2362_s5 + $0x28] sm:$0xff]   ;;  %v2060_v17 = vld [vmem:[%s2362_s5 + $0x70] sm:$0xff]  }
 0x118   :  { %v2059_v16 = vld [vmem:[%s2362_s5 + $0xa8] sm:$0xff]  }
 0x11a   :  { %1070 = vmatpush1.bf16.msra.mxu0 %v1988_v18  ;;  %1152 = vmatpush1.bf16.msra.mxu1 %v1991_v19  ;;  %v2061_v18 = vld [vmem:[%s2362_s5 + $0xf0] sm:$0xff]  }
 0x11b   :  { %1071 = vmatprep.subr.bf16.mxu0 %v1996_v21  ;;  %1153 = vmatprep.subr.bf16.mxu1 %v1999_v23  ;;  %v2062_v19 = vld [vmem:[%s2362_s5 + $0x30] sm:$0xff]   ;;  %v2064_v23 = vld [vmem:[%s2362_s5 + $0x78] sm:$0xff]  }
 0x11c   :  { %v2063_v21 = vld [vmem:[%s2362_s5 + $0xb0] sm:$0xff]  }
 0x11e   :  { %1072 = vmatpush1.bf16.msra.mxu0 %v1994_v24  ;;  %1154 = vmatpush1.bf16.msra.mxu1 %v1997_v26  ;;  %v2065_v24 = vld [vmem:[%s2362_s5 + $0xf8] sm:$0xff]  }
 0x11f   :  { %1073 = vmatprep.subr.bf16.mxu0 %v2002_v27  ;;  %1155 = vmatprep.subr.bf16.mxu1 %v2005_v28  ;;  %v2066_v26 = vld [vmem:[%s2362_s5 + $0x38] sm:$0xff]   ;;  %v1740_v28 = vld.sshfl [vmem:[%s2361_s4] sm:$0x33 pattern:$0x75316420] }
 0x120   :  { %v2067_v27 = vld [vmem:[%s2362_s5 + $0xb8] sm:$0xff]  }
 0x122   :  { %1074 = vmatpush1.bf16.msra.mxu0 %v2000_v29  ;;  %1156 = vmatpush1.bf16.msra.mxu1 %v2003_v30  ;;  %v1189_v29 = vcombine.high %v1740_v28, %v1740_v28  ;;  %v1196_v30 = vrot.slane %v1740_v28, %v2208_v20 }
 0x123   :  { %1075 = vmatprep.subr.bf16.mxu0 %v2008_v31  ;;  %1157 = vmatprep.subr.bf16.mxu1 %v2011_v32 }
 0x124   :  { %v1203_v31 = vrot.slane %v1189_v29, %v2208_v20  ;;  %v1204_v32 = vcombine.high %v1196_v30, %v1196_v30 }
 0x126   :  { %1076 = vmatpush1.bf16.msra.mxu0 %v2006_v33  ;;  %1158 = vmatpush1.bf16.msra.mxu1 %v2009_v34  ;;  %v1205_v33 = vcombine.high %v1203_v31, %v1203_v31  ;;  %v1207_v34 = vpack.i.b16 %v1196_v30, %v1196_v30 }
 0x127   :  { %1077 = vmatprep.subr.bf16.mxu0 %v2014_v35  ;;  %1159 = vmatprep.subr.bf16.mxu1 %v2017_v36  ;;  %v1221_v35 = vpack.i.b16 %v1204_v32, %v1204_v32  ;;  %v1214_v36 = vpack.i.b16 %v1203_v31, %v1203_v31 }
 0x129   :  { %v1226_v40 = vrot.slane %v1221_v35, %v2216_v25 }
 0x12a   :  { %1078 = vmatpush1.bf16.msra.mxu0 %v2012_v37  ;;  %1160 = vmatpush1.bf16.msra.mxu1 %v2015_v39  ;;  %v1228_v37 = vpack.i.b16 %v1205_v33, %v1205_v33  ;;  %v1212_v39 = vrot.slane %v1207_v34, %v2216_v25 }
 0x12b   :  { %1079 = vmatprep.subr.bf16.mxu0 %v2020_v41  ;;  %1161 = vmatprep.subr.bf16.mxu1 %v2023_v42 }
 0x12e   :  { %1080 = vmatpush1.bf16.msra.mxu0 %v2018_v43  ;;  %1162 = vmatpush1.bf16.msra.mxu1 %v2021_v44  ;;  %v1219_v43 = vrot.slane %v1214_v36, %v2216_v25  ;;  %v1233_v44 = vrot.slane %v1228_v37, %v2216_v25 }
 0x12f   :  { %1081 = vmatprep.subr.bf16.mxu0 %v2026_v46  ;;  %1163 = vmatprep.subr.bf16.mxu1 %v2029_v47 }
 0x132   :  { %1082 = vmatpush1.bf16.msra.mxu0 %v2024_v48  ;;  %1164 = vmatpush1.bf16.msra.mxu1 %v2027_v49 }
 0x133   :  { %1083 = vmatprep.subr.bf16.mxu0 %v2032_v51  ;;  %1165 = vmatprep.subr.bf16.mxu1 %v2035_v52 }
 0x136   :  { %1084 = vmatpush1.bf16.msra.mxu0 %v2030_v53  ;;  %1166 = vmatpush1.bf16.msra.mxu1 %v2033_v54 }
 0x137   :  { %1774 = vmatprep.subr.bf16.mxu0 %v2036_v56  ;;  %1796 = vmatprep.subr.bf16.mxu1 %v2037_v38 }
 0x139   :  { %1086 = vmatmul.mubr.bf16.vlgmr.msra.gmra.mrb[4].mxu0 %v242_v59  ;;  %1168 = vmatmul.mubr.bf16.vlgmr.msra.gmra.mrb[4].mxu1 %v242_v59 }
 0x13a   :  { %1775 = vmatpush3.bf16.msra.mxu0 %v2038_v57  ;;  %1797 = vmatpush3.bf16.msra.mxu1 %v2039_v58 }
 0x13b   :  { %1776 = vmatprep.subr.bf16.mxu0 %v2040_v60  ;;  %1798 = vmatprep.subr.bf16.mxu1 %v2041_v61  ;;  %v1741_v61 = vld [vmem:[%s2363_s6] ss:$0 sm:$0xff] }
 0x13e   :  { %1777 = vmatpush3.bf16.msra.mxu0 %v2042_v62  ;;  %1799 = vmatpush3.bf16.msra.mxu1 %v2043_v63 }
 0x13f   :  { %1778 = vmatprep.subr.bf16.mxu0 %v2044_v1  ;;  %1800 = vmatprep.subr.bf16.mxu1 %v2045_v2 }
 0x142   :  { %1779 = vmatpush3.bf16.msra.mxu0 %v2046_v3  ;;  %1801 = vmatpush3.bf16.msra.mxu1 %v2047_v4 }
 0x143   :  { %1780 = vmatprep.subr.bf16.mxu0 %v2048_v5  ;;  %1802 = vmatprep.subr.bf16.mxu1 %v2049_v6 }
 0x146   :  { %1781 = vmatpush3.bf16.msra.mxu0 %v2050_v7  ;;  %1803 = vmatpush3.bf16.msra.mxu1 %v2051_v8 }
 0x147   :  { %1782 = vmatprep.subr.bf16.mxu0 %v2052_v9  ;;  %1804 = vmatprep.subr.bf16.mxu1 %v2053_v10 }
 0x14a   :  { %1783 = vmatpush3.bf16.msra.mxu0 %v2054_v11  ;;  %1805 = vmatpush3.bf16.msra.mxu1 %v2055_v12 }
 0x14b   :  { %1784 = vmatprep.subr.bf16.mxu0 %v2056_v13  ;;  %1806 = vmatprep.subr.bf16.mxu1 %v2057_v14 }
 0x14e   :  { %1785 = vmatpush3.bf16.msra.mxu0 %v2058_v15  ;;  %1807 = vmatpush3.bf16.msra.mxu1 %v2059_v16 }
 0x14f   :  { %1786 = vmatprep.subr.bf16.mxu0 %v2060_v17  ;;  %1808 = vmatprep.subr.bf16.mxu1 %v2061_v18 }
 0x152   :  { %1787 = vmatpush3.bf16.msra.mxu0 %v2062_v19  ;;  %1809 = vmatpush3.bf16.msra.mxu1 %v2063_v21 }
 0x153   :  { %1788 = vmatprep.subr.bf16.mxu0 %v2064_v23  ;;  %1810 = vmatprep.subr.bf16.mxu1 %v2065_v24 }
 0x156   :  { %1789 = vmatpush3.bf16.msra.mxu0 %v2066_v26  ;;  %1811 = vmatpush3.bf16.msra.mxu1 %v2067_v27 }
 0x20c   :  { %v1087_v41 = vpop.f32.mrb[4].mxu0  ;;  %v1169_v42 = vpop.f32.mrb[4].mxu1 }
 0x20d   :  { %v1176_v45 = vpack.c.bf16 %v1087_v41, %v1087_v41  ;;  %v1178_v46 = vpack.c.bf16 %v1169_v42, %v1169_v42  ;;  %v1089_v47 = vpop.f32.mrb[5].mxu0  ;;  %v1171_v20 = vpop.f32.mrb[5].mxu1 }
 0x20e   :  { %v1177_v48 = vpack.c.bf16 %v1089_v47, %v1089_v47  ;;  %v1179_v49 = vpack.c.bf16 %v1171_v20, %v1171_v20  ;;  %v1091_v50 = vpop.f32.mrb[6].mxu0  ;;  %v1173_v22 = vpop.f32.mrb[6].mxu1 }
 0x20f   :  { %v1234_v51 = vadd.bf16 %v1212_v39, %v1176_v45  ;;  %v1236_v52 = vadd.bf16 %v1226_v40, %v1178_v46  ;;  %v1092_v53 = vpop.f32.mrb[7].mxu0  ;;  %v1174_v54 = vpop.f32.mrb[7].mxu1 }
 0x210   :  { %v1235_v55 = vadd.bf16 %v1219_v43, %v1177_v48  ;;  %v1237_v56 = vadd.bf16 %v1233_v44, %v1179_v49 }
 0x211   :  { %v1238_v25 = vmax.bf16 %v2119_v0, %v1234_v51  ;;  %v1240_v58 = vmax.bf16 %v2119_v0, %v1236_v52 }
 0x212   :  { %v1239_v38 = vmax.bf16 %v2119_v0, %v1235_v55  ;;  %v1241_v57 = vmax.bf16 %v2119_v0, %v1237_v56 }
 0x214   :  { %1537 = vmatprep.mubr.bf16.mxu0 %v1239_v38  ;;  %1577 = vmatprep.mubr.bf16.mxu1 %v1241_v57 }
 0x215   :  { %1538 = vmatmul.mubr.bf16.vlgmr.msra.gmra.mrb[8].mxu0 %v1238_v25  ;;  %1578 = vmatmul.mubr.bf16.vlgmr.msra.gmra.mrb[8].mxu1 %v1240_v58 }
 0x2e8   :  { %v1790_v59 = vpop.f32.mrb[8].mxu0  ;;  %v1812_v60 = vpop.f32.mrb[8].mxu1 }
 0x2e9   :  { %v1791_v62 = vpop.f32.mrb[9].mxu0  ;;  %v1813_v63 = vpop.f32.mrb[9].mxu1 }
 0x2ea   :  { %v1792_v1 = vadd.f32 %v1791_v62, %v1790_v59  ;;  %v1814_v2 = vadd.f32 %v1813_v63, %v1812_v60  ;;  %v1793_v3 = vpop.f32.mrb[10].mxu0  ;;  %v1815_v4 = vpop.f32.mrb[10].mxu1 }
 0x2eb   :  { %v1794_v5 = vpop.f32.mrb[11].mxu0  ;;  %v1816_v6 = vpop.f32.mrb[11].mxu1 }
 0x2ec   :  { %v1540_v0 = vadd.f32 %v1792_v1, %v1741_v61 }
 0x2ee   :  { %v1580_v7 = vadd.f32 %v1814_v2, %v1540_v0 }
 0x2f0   :  { %1585 = vst.msk [vmem:[#allocation5] sm:$0xff] %vm92_vm0, %v1580_v7 }
 0x2f1   :  { %2101 = shalt.err (!%p2098_p12)
}
 0x2f2   :  { %s2102_s23 = scalar_lea.hbm %s2364_s7, 128 }
 0x2f3   :  { %p2103_p13 = scmp.ne.s32.totalorder %s2364_s7, %s2102_s23  ;;  %p2106_p0 = scmp.lt.u32.totalorder %s2102_s23, %s2364_s7 }
 0x2f5   :  { %p2108_p1 = pnand %p2106_p0, %p2103_p13 }
 0x2f7   :  { %2111 = shalt.err (!%p2108_p1)
}
 0x2f8   :  { %1595 = dma.vmem_to_hbm [thread:$0]  %s1593_s3, 128, %s2364_s7, [#allocation4]  }
 0x2f9   :  { %2114 = dma.done.wait [#allocation4], 128  }
 0x2fa   :  { %2115 = vsyncadd [#allocation4], 4294967168 }
 0x2fb   :  { %1599 = vsyncpa [#allocation3], 1 }
 0x2fc   :  { %1600 = vsyncpa [#allocation4], 1 }

</bundles_post_ra>
